<compile_context>
chip_gen: v5e
topology: v5e:2x2
jax: 0.10.0
libtpu: 0.0.40
codegen_flags: <defaults>
</compile_context>

<pallas_src>
import functools

import jax
import jax.numpy as jnp
from jax import lax
from jax.experimental import pallas as pl
from jax.experimental.pallas import tpu as pltpu


def _ce_kernel(x_ref, t_ref, o_ref, *, tvc):
    # x_ref: (1, C, TV, 128) logits tile
    # t_ref: (1, TV, 128) int32 labels
    # o_ref: (1, TV, 128) f32 per-voxel loss
    c = x_ref.shape[1]
    tv = x_ref.shape[2]
    n_chunks = tv // tvc  # tv is always a multiple of tvc (enforced in wrapper)

    def body(i, carry):
        r = pl.multiple_of(i * tvc, tvc)
        rows = pl.ds(r, tvc)
        t = t_ref[0, rows, :]                                     # (tvc, 128) i32

        # Pass 1: class-wise max, unrolled over the small class axis (VPU only).
        m = x_ref[0, 0, rows, :].astype(jnp.float32)
        for cc in range(1, c):
            m = jnp.maximum(m, x_ref[0, cc, rows, :].astype(jnp.float32))

        # Pass 2: sum of shifted exps (EUP) + target-logit pick (compare+select).
        # Per-class slabs are re-loaded from VMEM to keep live vregs bounded.
        s = jnp.zeros_like(m)
        picked = jnp.zeros_like(m)
        for cc in range(c):
            z = x_ref[0, cc, rows, :].astype(jnp.float32) - m
            s = s + jnp.exp(z)
            picked = jnp.where(t == cc, z, picked)

        # loss = logsumexp(x) - x[target]; the max shift cancels exactly.
        loss = jnp.log(s) - picked
        # PyTorch's ignore_index (-100 default) / any out-of-range label -> 0.
        loss = jnp.where((t >= 0) & (t < c), loss, 0.0)
        o_ref[0, rows, :] = loss
        return carry

    unroll = n_chunks if n_chunks <= 8 else 4
    lax.fori_loop(0, n_chunks, body, 0, unroll=unroll)


def cross_entropy_3d(inputs, targets, vmem_budget_bytes=10 << 20):
    """inputs: (N, C, D, H, W) float logits; targets: (N, D, H, W) int labels.

    Returns per-voxel NLL of shape (N, D, H, W), float32 (reduction='none').
    """
    # TODO(synk): per-class `weight` tensor is not handled (module default is
    # weight=None).

    # Mimic the PyTorch forward's squeeze(0) quirk (no-op unless dim 0 is 1).
    if inputs.shape != targets.shape and targets.shape[0] == 1 and targets.ndim > 4:
        targets = jnp.squeeze(targets, axis=0)

    n, c, d, h, w = inputs.shape
    assert targets.shape == (n, d, h, w)
    dhw = d * h * w

    x = inputs.reshape(n, c, dhw)
    t = targets.astype(jnp.int32).reshape(n, dhw)

    # Only pad when the voxel count is not lane-aligned (at most 127 voxels).
    # No tile-driven padding: ragged last blocks use Pallas' masked edge-block
    # reads/writes instead of a full-tensor HBM rewrite.
    dhw_pad = pl.cdiv(dhw, 128) * 128
    if dhw_pad != dhw:
        # TODO(synk): mask the ragged lane tail in-kernel to drop this copy too.
        x = jnp.pad(x, ((0, 0), (0, 0), (0, dhw_pad - dhw)))
        t = jnp.pad(t, ((0, 0), (0, dhw_pad - dhw)), constant_values=-1)
    nv = dhw_pad // 128

    # Sublane+lane dense views: voxels -> (nv, 128).  Free reshapes.
    x = x.reshape(n, c, nv, 128)
    t = t.reshape(n, nv, 128)

    in_item = jnp.dtype(inputs.dtype).itemsize

    # VMEM-aware tile height: double-buffered logits + targets + f32 output.
    bytes_per_row = 128 * (2 * c * in_item + 2 * 4 + 2 * 4)
    if nv <= 8:
        tv = nv           # full extent (satisfies the (8,128) / full-dim rule)
        tvc = nv
    else:
        tv = min(nv, max(8, vmem_budget_bytes // bytes_per_row))
        # Keep >= ~8 total grid steps so v7x megacore can feed both TCs.
        min_steps = -(-8 // n)                   # ceil(8 / n)
        tv = min(tv, -(-nv // min_steps))        # ceil(nv / min_steps)
        tv = max(8, (tv // 8) * 8)               # multiple of 8 sublanes
        tvc = 8

    grid = (n, pl.cdiv(nv, tv))

    tile_bytes = tv * bytes_per_row
    vmem_limit = int(min(max(tile_bytes + (4 << 20), 8 << 20), 30 << 20))

    # Advisory cost: this kernel is HBM-bandwidth bound.
    voxels = n * nv * 128
    cost = pl.CostEstimate(
        flops=int(6 * c * voxels + 4 * voxels),
        transcendentals=int(c * voxels + voxels),          # exps + final log
        bytes_accessed=int(x.size * in_item + t.size * 4 + voxels * 4),
    )

    out = pl.pallas_call(
        functools.partial(_ce_kernel, tvc=tvc),
        out_shape=jax.ShapeDtypeStruct((n, nv, 128), jnp.float32),
        grid_spec=pltpu.PrefetchScalarGridSpec(
            num_scalar_prefetch=0,
            grid=grid,
            in_specs=[
                pl.BlockSpec((1, c, tv, 128), lambda b, i: (b, 0, i, 0)),
                pl.BlockSpec((1, tv, 128), lambda b, i: (b, i, 0)),
            ],
            out_specs=pl.BlockSpec((1, tv, 128), lambda b, i: (b, i, 0)),
        ),
        compiler_params=pltpu.CompilerParams(
            dimension_semantics=("parallel", "parallel"),
            vmem_limit_bytes=vmem_limit,
        ),
        cost_estimate=cost,
    )(x, t)

    return out.reshape(n, dhw_pad)[:, :dhw].reshape(n, d, h, w)


def _reference(inputs, targets):
    # plain-JAX reference (F.cross_entropy with reduction='none')
    if inputs.shape != targets.shape and targets.shape[0] == 1 and targets.ndim > 4:
        targets = jnp.squeeze(targets, axis=0)
    logp = jax.nn.log_softmax(inputs.astype(jnp.float32), axis=1)  # (N,C,D,H,W)
    tgt = targets.astype(jnp.int32)
    picked = jnp.take_along_axis(logp, tgt[:, None], axis=1)[:, 0]
    return -picked


if __name__ == "__main__":
    key = jax.random.PRNGKey(0)

    # Shapes exercise: small-nv (full-extent block), multi-chunk compute loop,
    # and a ragged last block (nv not a multiple of the tile height).
    shapes = [
        (2, 4, 8, 8, 8),      # dhw=512,  nv=4  -> single full-extent block
        (2, 4, 16, 16, 32),   # dhw=8192, nv=64 -> tv=16, 2 compute chunks
        (2, 4, 4, 8, 48),     # dhw=1536, nv=12 -> tv=8, ragged last block
    ]
    for (N, C, D, H, W) in shapes:
        key, k1, k2 = jax.random.split(key, 3)
        inputs = jax.random.normal(k1, (N, C, D, H, W), dtype=jnp.float32)
        targets = jax.random.randint(k2, (N, D, H, W), 0, C, dtype=jnp.int32)

        loss = cross_entropy_3d(inputs, targets)
        jax.block_until_ready(loss)

        ref = _reference(inputs, targets)
        assert loss.shape == (N, D, H, W)
        assert jnp.allclose(loss, ref, atol=1e-5, rtol=1e-5), (
            (N, C, D, H, W), float(jnp.max(jnp.abs(loss - ref))))

    print("KERNEL_OK")
</pallas_src>

<mosaic_0001>
module attributes {stable_mosaic.version = 11 : i64} {
  func.func @_ce_kernel(%arg0: i32, %arg1: i32, %arg2: memref<1x4x4x128xf32, #tpu.memory_space<vmem>>, %arg3: memref<1x4x128xi32, #tpu.memory_space<vmem>>, %arg4: memref<1x4x128xf32, #tpu.memory_space<vmem>>) attributes {dimension_semantics = [#tpu.dimension_semantics<parallel>, #tpu.dimension_semantics<parallel>], iteration_bounds = array<i64: 2, 1>, scalar_prefetch = 0 : i64, scratch_operands = 0 : i64, tpu.core_type = #tpu.core_type<tc>, window_params = [{transform_indices = @transform_0, window_bounds = array<i64: 1, 4, 4, 128>}, {transform_indices = @transform_1, window_bounds = array<i64: 1, 4, 128>}, {transform_indices = @transform_2, window_bounds = array<i64: 1, 4, 128>}]} {
    %c0_i32 = arith.constant 0 : i32
    %c4_i32 = arith.constant 4 : i32
    %0 = arith.muli %c0_i32, %c4_i32 : i32
    %1 = tpu.assume_multiple %0, 4 : i32
    %c0 = arith.constant 0 : index
    %2 = arith.index_cast %1 : i32 to index
    %c0_0 = arith.constant 0 : index
    %3 = vector.load %arg3[%c0, %2, %c0_0] : memref<1x4x128xi32, #tpu.memory_space<vmem>>, vector<1x4x128xi32>
    %4 = vector.shape_cast %3 : vector<1x4x128xi32> to vector<4x128xi32>
    %c0_1 = arith.constant 0 : index
    %c0_2 = arith.constant 0 : index
    %5 = arith.index_cast %1 : i32 to index
    %c0_3 = arith.constant 0 : index
    %6 = vector.load %arg2[%c0_1, %c0_2, %5, %c0_3] : memref<1x4x4x128xf32, #tpu.memory_space<vmem>>, vector<1x1x4x128xf32>
    %7 = vector.shape_cast %6 : vector<1x1x4x128xf32> to vector<4x128xf32>
    %c0_4 = arith.constant 0 : index
    %c1 = arith.constant 1 : index
    %8 = arith.index_cast %1 : i32 to index
    %c0_5 = arith.constant 0 : index
    %9 = vector.load %arg2[%c0_4, %c1, %8, %c0_5] : memref<1x4x4x128xf32, #tpu.memory_space<vmem>>, vector<1x1x4x128xf32>
    %10 = vector.shape_cast %9 : vector<1x1x4x128xf32> to vector<4x128xf32>
    %11 = arith.maximumf %7, %10 : vector<4x128xf32>
    %c0_6 = arith.constant 0 : index
    %c2 = arith.constant 2 : index
    %12 = arith.index_cast %1 : i32 to index
    %c0_7 = arith.constant 0 : index
    %13 = vector.load %arg2[%c0_6, %c2, %12, %c0_7] : memref<1x4x4x128xf32, #tpu.memory_space<vmem>>, vector<1x1x4x128xf32>
    %14 = vector.shape_cast %13 : vector<1x1x4x128xf32> to vector<4x128xf32>
    %15 = arith.maximumf %11, %14 : vector<4x128xf32>
    %c0_8 = arith.constant 0 : index
    %c3 = arith.constant 3 : index
    %16 = arith.index_cast %1 : i32 to index
    %c0_9 = arith.constant 0 : index
    %17 = vector.load %arg2[%c0_8, %c3, %16, %c0_9] : memref<1x4x4x128xf32, #tpu.memory_space<vmem>>, vector<1x1x4x128xf32>
    %18 = vector.shape_cast %17 : vector<1x1x4x128xf32> to vector<4x128xf32>
    %19 = arith.maximumf %15, %18 : vector<4x128xf32>
    %cst = arith.constant 0.000000e+00 : f32
    %20 = vector.broadcast %cst : f32 to vector<4x128xf32>
    %cst_10 = arith.constant 0.000000e+00 : f32
    %21 = vector.broadcast %cst_10 : f32 to vector<4x128xf32>
    %c0_11 = arith.constant 0 : index
    %c0_12 = arith.constant 0 : index
    %22 = arith.index_cast %1 : i32 to index
    %c0_13 = arith.constant 0 : index
    %23 = vector.load %arg2[%c0_11, %c0_12, %22, %c0_13] : memref<1x4x4x128xf32, #tpu.memory_space<vmem>>, vector<1x1x4x128xf32>
    %24 = vector.shape_cast %23 : vector<1x1x4x128xf32> to vector<4x128xf32>
    %25 = arith.subf %24, %19 : vector<4x128xf32>
    %26 = math.exp %25 : vector<4x128xf32>
    %27 = arith.addf %20, %26 : vector<4x128xf32>
    %c0_i32_14 = arith.constant 0 : i32
    %28 = vector.broadcast %c0_i32_14 : i32 to vector<4x128xi32>
    %29 = arith.cmpi eq, %4, %28 : vector<4x128xi32>
    %30 = arith.select %29, %25, %21 : vector<4x128xi1>, vector<4x128xf32>
    %c0_15 = arith.constant 0 : index
    %c1_16 = arith.constant 1 : index
    %31 = arith.index_cast %1 : i32 to index
    %c0_17 = arith.constant 0 : index
    %32 = vector.load %arg2[%c0_15, %c1_16, %31, %c0_17] : memref<1x4x4x128xf32, #tpu.memory_space<vmem>>, vector<1x1x4x128xf32>
    %33 = vector.shape_cast %32 : vector<1x1x4x128xf32> to vector<4x128xf32>
    %34 = arith.subf %33, %19 : vector<4x128xf32>
    %35 = math.exp %34 : vector<4x128xf32>
    %36 = arith.addf %27, %35 : vector<4x128xf32>
    %c1_i32 = arith.constant 1 : i32
    %37 = vector.broadcast %c1_i32 : i32 to vector<4x128xi32>
    %38 = arith.cmpi eq, %4, %37 : vector<4x128xi32>
    %39 = arith.select %38, %34, %30 : vector<4x128xi1>, vector<4x128xf32>
    %c0_18 = arith.constant 0 : index
    %c2_19 = arith.constant 2 : index
    %40 = arith.index_cast %1 : i32 to index
    %c0_20 = arith.constant 0 : index
    %41 = vector.load %arg2[%c0_18, %c2_19, %40, %c0_20] : memref<1x4x4x128xf32, #tpu.memory_space<vmem>>, vector<1x1x4x128xf32>
    %42 = vector.shape_cast %41 : vector<1x1x4x128xf32> to vector<4x128xf32>
    %43 = arith.subf %42, %19 : vector<4x128xf32>
    %44 = math.exp %43 : vector<4x128xf32>
    %45 = arith.addf %36, %44 : vector<4x128xf32>
    %c2_i32 = arith.constant 2 : i32
    %46 = vector.broadcast %c2_i32 : i32 to vector<4x128xi32>
    %47 = arith.cmpi eq, %4, %46 : vector<4x128xi32>
    %48 = arith.select %47, %43, %39 : vector<4x128xi1>, vector<4x128xf32>
    %c0_21 = arith.constant 0 : index
    %c3_22 = arith.constant 3 : index
    %49 = arith.index_cast %1 : i32 to index
    %c0_23 = arith.constant 0 : index
    %50 = vector.load %arg2[%c0_21, %c3_22, %49, %c0_23] : memref<1x4x4x128xf32, #tpu.memory_space<vmem>>, vector<1x1x4x128xf32>
    %51 = vector.shape_cast %50 : vector<1x1x4x128xf32> to vector<4x128xf32>
    %52 = arith.subf %51, %19 : vector<4x128xf32>
    %53 = math.exp %52 : vector<4x128xf32>
    %54 = arith.addf %45, %53 : vector<4x128xf32>
    %c3_i32 = arith.constant 3 : i32
    %55 = vector.broadcast %c3_i32 : i32 to vector<4x128xi32>
    %56 = arith.cmpi eq, %4, %55 : vector<4x128xi32>
    %57 = arith.select %56, %52, %48 : vector<4x128xi1>, vector<4x128xf32>
    %58 = math.log %54 : vector<4x128xf32>
    %59 = arith.subf %58, %57 : vector<4x128xf32>
    %c0_i32_24 = arith.constant 0 : i32
    %60 = vector.broadcast %c0_i32_24 : i32 to vector<4x128xi32>
    %61 = arith.cmpi sge, %4, %60 : vector<4x128xi32>
    %c4_i32_25 = arith.constant 4 : i32
    %62 = vector.broadcast %c4_i32_25 : i32 to vector<4x128xi32>
    %63 = arith.cmpi slt, %4, %62 : vector<4x128xi32>
    %64 = arith.andi %61, %63 : vector<4x128xi1>
    %cst_26 = arith.constant 0.000000e+00 : f32
    %65 = vector.broadcast %cst_26 : f32 to vector<4x128xf32>
    %66 = arith.select %64, %59, %65 : vector<4x128xi1>, vector<4x128xf32>
    %c0_27 = arith.constant 0 : index
    %67 = arith.index_cast %1 : i32 to index
    %c0_28 = arith.constant 0 : index
    %68 = vector.load %arg4[%c0_27, %67, %c0_28] : memref<1x4x128xf32, #tpu.memory_space<vmem>>, vector<1x4x128xf32>
    %69 = vector.shape_cast %68 : vector<1x4x128xf32> to vector<4x128xf32>
    %70 = vector.shape_cast %66 : vector<4x128xf32> to vector<1x4x128xf32>
    tpu.vector_store %arg4[%c0_27, %67, %c0_28], %70 {strides = array<i32>} : memref<1x4x128xf32, #tpu.memory_space<vmem>>, vector<1x4x128xf32>,
    %c1_i32_29 = arith.constant 1 : i32
    return
  }
  func.func @transform_0(%arg0: i32, %arg1: i32) -> (i32, i32, i32, i32) {
    %c0_i32 = arith.constant 0 : i32
    %c0_i32_0 = arith.constant 0 : i32
    %c0_i32_1 = arith.constant 0 : i32
    return %arg0, %c0_i32, %arg1, %c0_i32_0 : i32, i32, i32, i32
  }
  func.func @transform_1(%arg0: i32, %arg1: i32) -> (i32, i32, i32) {
    %c0_i32 = arith.constant 0 : i32
    %c0_i32_0 = arith.constant 0 : i32
    return %arg0, %arg1, %c0_i32 : i32, i32, i32
  }
  func.func @transform_2(%arg0: i32, %arg1: i32) -> (i32, i32, i32) {
    %c0_i32 = arith.constant 0 : i32
    %c0_i32_0 = arith.constant 0 : i32
    return %arg0, %arg1, %c0_i32 : i32, i32, i32
  }
}

</mosaic_0001>

<bundles_post_ra>
// kernel: tpu_custom_call.1
= control target key start
LH: loop header
LB: loop body
LE: loop exit
PB: predicated region body
PF: predicated region fallthrough
CT: control target
= control target key end

     0   :  { %7 = vsyncpa [#allocation3], 0  ;;  %s801_s0 = inlined_call_operand.hbm [shape: f32[2,4,4,128], index: 0, kind: input, shape index: {}]   ;;  %s802_s1 = inlined_call_operand.hbm [shape: s32[2,4,128], index: 1, kind: input, shape index: {}]   ;;  %s803_s2 = inlined_call_operand.hbm [shape: f32[2,4,128], index: 2, kind: output, shape index: {}]  }
   0x1   :  { %9 = vsyncpa [#allocation3 + $0x1], 0 }
   0x2   :  { %10 = vsyncpa [#allocation6], 0 }
   0x3   :  { %12 = vsyncpa [#allocation6 + $0x1], 0 }
   0x4   :  { %13 = vsyncpa [#allocation4], 0 }
   0x5   :  { %15 = vsyncpa [#allocation4 + $0x1], 0  ;;  %s659_s9 = smov 0   ;;  %s661_s10 = smov 0  }
   0x6   :  { %s663_s11 = smov 0   ;;  %s665_s12 = smov 0  }
   0x7   :  { %s667_s13 = smov 0   ;;  %s669_s14 = smov 0  }
   0x8 LB: > { %s394_s15 = sadd.s32 4294967295, %s640_s14   ;;  %s395_s16 = sadd.s32 4294967294, %s640_s14   ;;  %s640_s14 = sphi %s669_s14, %s21_s14   ;;  %s636_s13 = sphi %s667_s13, %s813_s13   ;;  %s632_s12 = sphi %s665_s12, %s812_s12   ;;  %s628_s11 = sphi %s663_s11, %s811_s11   ;;  %s624_s10 = sphi %s661_s10, %s810_s10   ;;  %s620_s9 = sphi %s659_s9, %s809_s9  }
   0x9   : > { %s33_s17 = sadd.s32 1, %s636_s13  ;;  %s42_s18 = sadd.s32 1, %s628_s11 }
   0xa   : > { %p35_p0 = scmp.ge.s32.totalorder %s33_s17, 2  ;;  %p49_p1 = scmp.ne.s32.totalorder %s628_s11, %s624_s10 }
   0xb   : > { %p50_p2 = scmp.eq.s32.totalorder %s640_s14, 0  ;;  %p55_p3 = scmp.ne.s32.totalorder %s624_s10, %s620_s9 }
   0xc   : > { %s815_s17 = smov (%p35_p0, %s33_s17), 0  ;;  %p56_p5 = scmp.eq.s32.totalorder %s394_s15, 0 }
   0xd   : > { %p700_p4 = por %p50_p2, %p49_p1  ;;  %s37_s20 = ssub.s32 %s636_s13, %s815_s17 }
   0xe   : > { %p109_p6 = scmp.eq.s32.totalorder %s394_s15, 1  ;;  %p40_p7 = scmp.eq.s32.totalorder %s37_s20, 0 }
   0xf   : > { %p706_p8 = por %p56_p5, %p55_p3  ;;  %p115_p10 = scmp.eq.s32.totalorder %s395_s16, 1 }
  0x10   : > { %p710_p9 = por %p109_p6, %p49_p1  ;;  %p397_p12 = scmp.ge.s32.totalorder %s640_s14, 2 }
  0x11   : > { %s715_s23 = scalar_select %p40_p7, %s628_s11, %s42_s18  }
  0x12   : > { %p717_p11 = por %p115_p10, %p55_p3  ;;  %p432_p13 = scmp.lt.s32.totalorder %s640_s14, 2 }
  0x13   : > { %s135_s25 = sand.u32 1, %s628_s11   ;;  %s414_s27 = sshll.u32 %s636_s13, 4 }
  0x14   : > { %s398_s26 = sshll.u32 %s135_s25, 4  ;;  %s145_s30 = scalar_lea.hbm %s801_s0, %s414_s27 }
  0x15   : > { %s139_s3 = scalar_lea.vmem [#allocation2], %s398_s26  ;;  %s146_s5 = sshll.u32 %s145_s30, 4  ;;  %s147_s5 = int_to_ptr.hbm [resolvable:$true] %s146_s5 }
  0x16   : > { %s148_s4 = sshll.u32 %s139_s3, 4  ;;  %p730_p0 = pnand %p432_p13, %p700_p4  ;;  %s149_s4 = int_to_ptr.vmem [resolvable:$true] %s148_s4 }
  0x17   : > { %p403_p1 = scmp.ge.s32.totalorder %s640_s14, 1  ;;  %s136_s7 = scalar_lea.sflag [#allocation3], %s135_s25 }
  0x18   : > { %s642_s8 = smov 64   ;;  %s643_s15 = smov 4  }
  0x19   : > { %424 = dma.hbm_to_vmem [thread:$0]  (!%p730_p0), %s147_s5, 256, %s149_s4, %s136_s7, %s642_s8, %s642_s8, %s643_s15  }
  0x1a   : > { %p176_p2 = scmp.lt.s32.totalorder %s640_s14, 3  ;;  %s401_s16 = sshll.u32 %s135_s25, 2 }
  0x1b   : > { %s402_s18 = sshll.u32 %s636_s13, 2  ;;  %s162_s27 = scalar_lea.vmem [#allocation5], %s401_s16 }
  0x1c   : > { %p177_p3 = pnand %p403_p1, %p176_p2  ;;  %s167_s19 = scalar_lea.hbm %s802_s1, %s402_s18 }
  0x1d   : > { %s171_s28 = sshll.u32 %s162_s27, 4  ;;  %s169_s29 = sshll.u32 %s167_s19, 4  ;;  %s172_s28 = int_to_ptr.vmem [resolvable:$true] %s171_s28  ;;  %s170_s29 = int_to_ptr.hbm [resolvable:$true] %s169_s29 }
  0x1e   : > { %s159_s30 = scalar_lea.sflag [#allocation6], %s135_s25  ;;  %180 = sbr.rel (%p177_p3) target bundleno = 79 (0x4f), region = 28 }
  0x1f   : > { %427 = dma.hbm_to_vmem [thread:$0]  (!%p730_p0), %s170_s29, 64, %s172_s28, %s159_s30  }
  0x20   : > { %s745_s3 = sand.u32 (!%p177_p3), 1, %s624_s10  }
  0x21   : > { %s404_s4 = sshll.u32 (!%p177_p3), %s745_s3, 4  ;;  %s183_s5 = scalar_lea.sflag (!%p177_p3), [#allocation3], %s745_s3 }
  0x22   : > { %s186_s7 = scalar_lea.vmem (!%p177_p3), [#allocation2], %s404_s4 }
  0x23   : > { %607 = dma.done.wait (%p706_p8), %s183_s5, 256  }
  0x24   : > { %609 = vsyncadd (%p706_p8), %s183_s5, 4294967040  ;;  %s405_s25 = sshll.u32 %s745_s3, 2  ;;  %s193_s6 = scalar_lea.sflag [#allocation6], %s745_s3 }
  0x25   : > { %s196_s8 = scalar_lea.vmem [#allocation5], %s405_s25 }
  0x26   : > { %611 = dma.done.wait (%p706_p8), %s193_s6, 64  }
  0x27   : > { %613 = vsyncadd (%p706_p8), %s193_s6, 4294967232  ;;  %v224_v0 = vld [vmem:[%s186_s7] sm:$0xf]  ;;  %v407_v1 = vld [vmem:[%s186_s7 + $0x4] sm:$0xf]  ;;  %s411_s21 = sshll.u32 %s632_s12, 2 }
  0x28   : > { %v228_v2 = vmax.f32 %v224_v0, %v407_v1  ;;  %v408_v3 = vld [vmem:[%s186_s7 + $0x8] sm:$0xf]  ;;  %v409_v4 = vld [vmem:[%s186_s7 + $0xc] sm:$0xf]  ;;  %v223_v15 = vld [vmem:[%s196_s8] sm:$0xf]  ;;  %s281_s18 = scalar_lea.hbm %s803_s2, %s411_s21 }
  0x29   : > { %vm241_vm0 = vcmp.eq.s32.totalorder %v223_v15, 0  ;;  %vm247_vm1 = vcmp.eq.s32.totalorder %v223_v15, 1  ;;  %vm253_vm2 = vcmp.eq.s32.totalorder %v223_v15, 2  ;;  %vm259_vm3 = vcmp.eq.s32.totalorder %v223_v15, 3  ;;  %s222_s20 = scalar_lea.vmem [#allocation7], %s405_s25  ;;  %s285_s19 = sshll.u32 %s281_s18, 4  ;;  %s286_s19 = int_to_ptr.hbm [resolvable:$true] %s285_s19 }
  0x2a   : > { %v232_v5 = vmax.f32 %v228_v2, %v408_v3  ;;  %vm264_vm4 = vcmp.ge.s32.totalorder %v223_v15, 0  ;;  %vm265_vm5 = vcmp.lt.s32.totalorder %v223_v15, 4  ;;  %s283_s26 = sshll.u32 %s222_s20, 4  ;;  %s270_s12 = scalar_lea.sflag [#allocation4], %s745_s3  ;;  %s284_s26 = int_to_ptr.vmem [resolvable:$true] %s283_s26 }
  0x2b   : > { %vm266_vm6 = vmand %vm264_vm4, %vm265_vm5  ;;  %s568_s27 = sshra.s32 %s286_s19, 4  ;;  %s574_s4 = scalar_lea.hbm %s803_s2, 8  ;;  %s569_s27 = int_to_ptr.hbm [resolvable:$true] %s568_s27 }
  0x2c   : > { %v236_v6 = vmax.f32 %v232_v5, %v409_v4  ;;  %s570_s28 = scalar_lea.hbm %s569_s27, 4  ;;  %p575_p7 = scmp.lt.s32.totalorder %s569_s27, %s803_s2 }
  0x2d   : > { %p571_p4 = scmp.ne.s32.totalorder %s569_s27, %s570_s28  ;;  %p576_p8 = scmp.lt.s32.totalorder %s574_s4, %s570_s28 }
  0x2e   : > { %v237_v7 = vsub.f32 %v224_v0, %v236_v6  ;;  %v243_v8 = vsub.f32 %v407_v1, %v236_v6  ;;  %v249_v9 = vsub.f32 %v408_v3, %v236_v6  ;;  %v255_v10 = vsub.f32 %v409_v4, %v236_v6 }
  0x2f   : > { %p572_p5 = pnand %p571_p4, %p710_p9  ;;  %p577_p10 = por %p576_p8, %p575_p7 }
  0x30   : > { %v238_v11 = vmul.f32 1.442695, %v237_v7  ;;  %v244_v12 = vmul.f32 1.442695, %v243_v8  ;;  %v250_v13 = vmul.f32 1.442695, %v249_v9 }
  0x31   : > { %v256_v14 = vmul.f32 1.442695, %v255_v10  ;;  %v242_v22 = vsel %vm241_vm0, %v237_v7, 0.0  ;;  %p573_p6 = pneg %p572_p5 }
  0x32   : > { %484 = vpow2.f32 %v238_v11  ;;  %v248_v24 = vsel %vm247_vm1, %v243_v8, %v242_v22 }
  0x33   : > { %486 = vpow2.f32 %v244_v12  ;;  %v254_v25 = vsel %vm253_vm2, %v249_v9, %v248_v24  ;;  %p578_p13 = pnand %p577_p10, %p573_p6 }
  0x34   : > { %488 = vpow2.f32 %v250_v13  ;;  %v260_v27 = vsel %vm259_vm3, %v255_v10, %v254_v25 }
  0x35   : > { %490 = vpow2.f32 %v256_v14 }
  0x38   : > { %v485_v16 = vpop.eup %484 }
  0x39   : > { %v487_v17 = vpop.eup %486 }
  0x3a   : > { %v489_v18 = vpop.eup %488  ;;  %v246_v19 = vadd.f32 %v487_v17, %v485_v16 }
  0x3b   : > { %v491_v20 = vpop.eup %490 }
  0x3c   : > { %v252_v21 = vadd.f32 %v489_v18, %v246_v19 }
  0x3e   : > { %v258_v23 = vadd.f32 %v491_v20, %v252_v21 }
  0x40   : > { %492 = vlog2.f32 %v258_v23 }
  0x46   : > { %v493_v26 = vpop.eup %492 }
  0x47   : > { %v262_v28 = vmul.f32 0.6931472, %v493_v26 }
  0x49   : > { %v263_v29 = vsub.f32 %v262_v28, %v260_v27 }
  0x4b   : > { %v267_v30 = vsel %vm266_vm6, %v263_v29, 0.0 }
  0x4c   : > { %268 = vst [vmem:[%s222_s20] sm:$0xf] %v267_v30 }
  0x4d   : > { %581 = shalt.err (!%p578_p13)
}
  0x4e   : > { %419 = dma.vmem_to_hbm [thread:$0]  (%p710_p9), %s284_s26, 64, %s286_s19, %s270_s12  }
  0x4f PF: > { %s297_s3 = sand.u32 1, %s620_s9   ;;  %p429_p0 = pnand %p397_p12, %p717_p11 }
  0x50   : > { %s298_s25 = scalar_lea.sflag [#allocation4], %s297_s3 }
  0x51   : > { %p430_p1 = pneg %p429_p0 }
  0x53   : > { %615 = dma.done.wait (%p430_p1), %s298_s25, 64  }
  0x54   : > { %617 = vsyncadd (%p430_p1), %s298_s25, 4294967232  ;;  %s21_s14 = sadd.s32 1, %s640_s14   ;;  %s809_s9 = smov %s624_s10 }
  0x55   : > { %p18_p2 = scmp.ge.s32.totalorder %s21_s14, 4   ;;  %s810_s10 = smov %s628_s11 }
  0x56   : > { %s811_s11 = smov %s715_s23  ;;  %s812_s12 = smov %s636_s13 }
  0x57   : > { %s813_s13 = smov %s815_s17  ;;  %20 = sbr.rel (!%p18_p2) target bundleno = 8 (0x8), region = 89 }
  0x5c   :  { %304 = vsyncpa [#allocation3], 1 }
  0x5d   :  { %306 = vsyncpa [#allocation3 + $0x1], 1 }
  0x5e   :  { %307 = vsyncpa [#allocation6], 1 }
  0x5f   :  { %309 = vsyncpa [#allocation6 + $0x1], 1 }
  0x60   :  { %310 = vsyncpa [#allocation4], 1 }
  0x61   :  { %312 = vsyncpa [#allocation4 + $0x1], 1 }

</bundles_post_ra>
